<compile_context>
chip_gen: v7x
topology: tpu7x:2x2x1
jax: 0.10.0
libtpu: 0.0.40
codegen_flags: <defaults>
</compile_context>

<pallas_src>
import functools
import math

import jax
import jax.numpy as jnp
from jax import lax
from jax.experimental import pallas as pl
from jax.experimental.pallas import tpu as pltpu


def _round_up(x, m):
    return (x + m - 1) // m * m


def _cdiv(a, b):
    return -(-a // b)


def _device_kind():
    try:
        return jax.devices()[0].device_kind.lower()
    except Exception:
        return ""


def _lane_fold(x, width):
    """Sum a (rows, cols) tile into (rows, width) lane-partials with static-slice VPU adds."""
    rows, cols = x.shape
    assert cols % width == 0
    out = x[:, :width]
    for c in range(1, cols // width):
        out = out + x[:, c * width:(c + 1) * width]
    return out


def _ntxent_lse_kernel(a_ref, b_ref, o_ref, acc_ref, *,
                       inv_t, n_valid, n_pad, block_m, block_n, acc_w, exp_dtype):
    i = pl.program_id(0)           # row block (parallel)
    j = pl.program_id(1)           # column block (reduction axis, innermost)
    nj = pl.num_programs(1)
    row0 = i * block_m
    col0 = j * block_n

    @pl.when(j == 0)
    def _init():
        acc_ref[...] = jnp.zeros_like(acc_ref)

    # (block_m, block_n) tile of sim/T: operands already normalized and 1/sqrt(T)-scaled.
    # Contract the last dims of both operands (no transpose), f32 accumulation on the MXU.
    s = lax.dot_general(a_ref[...], b_ref[...],
                        dimension_numbers=(((1,), (1,)), ((), ())),
                        preferred_element_type=jnp.float32)

    # Bounded logits: sim/T <= 1/T, so use the static max 1/T (no row-max pass).
    logits = s - inv_t
    if exp_dtype != jnp.float32:
        logits = logits.astype(exp_dtype)      # optional bf16 exp (v6e/v7x EUP)
    p = jnp.exp(logits)                        # EUP

    # Inner-loop accumulation: 128-wide lane partials, pure VPU adds into the f32 scratch.
    acc_ref[...] += _lane_fold(p, acc_w).astype(jnp.float32)

    # Diagonal (self-similarity) correction: only on tiles intersecting the global diagonal.
    # Uses global row/col indices, valid for block_m != block_n.
    @pl.when((row0 < col0 + block_n) & (col0 < row0 + block_m))
    def _drop_diag():
        r = row0 + lax.broadcasted_iota(jnp.int32, (block_m, block_n), 0)
        c = col0 + lax.broadcasted_iota(jnp.int32, (block_m, block_n), 1)
        dmask = (r == c) & (r < n_valid)       # r < n_valid avoids pad double-subtraction
        corr = _lane_fold(jnp.where(dmask, p, jnp.zeros_like(p)), acc_w)
        acc_ref[...] -= corr.astype(jnp.float32)

    # Zero-padded columns: remove their contribution on every tile that contains them
    # (with decoupled tiles the padding can span more than one column tile).
    if n_pad:
        @pl.when(col0 + block_n > n_valid)
        def _drop_pad_cols():
            c = col0 + lax.broadcasted_iota(jnp.int32, (block_m, block_n), 1)
            corr = _lane_fold(jnp.where(c >= n_valid, p, jnp.zeros_like(p)), acc_w)
            acc_ref[...] -= corr.astype(jnp.float32)

    @pl.when(j == nj - 1)
    def _finalize():
        # Single cross-lane reduce + log per row block (XLU/EUP, off the inner loop).
        total = jnp.sum(acc_ref[...], axis=1, keepdims=True)          # (block_m, 1)
        lse = jnp.log(total) + inv_t
        rows = row0 + lax.broadcasted_iota(jnp.int32, (block_m, 1), 0)
        lse = jnp.where(rows < n_valid, lse, 0.0)                     # drop padded rows
        # lane-dense per-row-block partial (summed in the wrapper)
        o_ref[...] = jnp.full((1, 8, 128), jnp.sum(lse), dtype=jnp.float32)


def _pick_blocks(N, block_m, block_n, kind):
    """Chip-aware tile selection, clamped to the (padded) problem size."""
    n8 = _round_up(max(N, 1), 8)
    bn = _round_up(min(block_n, n8), 8)
    if block_m is None:
        # v6e needs ~680 flops/byte for the bf16 MXU roofline -> 1024-row tiles;
        # v7x (~310) and v5e (~240) are cleared by 512 and stay inside v7x's 64 MiB
        # physical / v5e's 16 MiB default-scoped VMEM budgets.
        bm = 1024 if "v6" in kind else 512
    else:
        bm = block_m
    bm = _round_up(min(bm, _round_up(N, bn)), 8)
    if "v7" in kind and block_m is None:
        # keep >= 2 row blocks so the "parallel" row axis feeds both TensorCores
        while bm > bn and _cdiv(N, bm) < 2:
            bm = max(8, _round_up(bm // 2, 8))
    return bm, bn


def simclr_loss(z_i, z_j, temperature, *, block_m=None, block_n=256,
                matmul_dtype=jnp.bfloat16, exp_dtype=jnp.float32):
    assert z_i.ndim == 2 and z_i.shape == z_j.shape
    B, D = z_i.shape
    N = 2 * B
    inv_t = 1.0 / float(temperature)
    kind = _device_kind()

    # O(N*D) prep (done once, plain JAX): normalize rows, fold temperature, positive term.
    z = jnp.concatenate([z_i, z_j], axis=0).astype(jnp.float32)
    norm = jnp.sqrt(jnp.sum(z * z, axis=-1, keepdims=True))
    z_hat = z / jnp.maximum(norm, 1e-8)                # torch CosineSimilarity eps clamp
    z_s = z_hat * jnp.float32(math.sqrt(inv_t))        # Gram(z_s) == sim / T

    # sum_i sim[i, pair(i)] == 2 * sum(z_s[:B] * z_s[B:])   (O(B*D), f32)
    pos_sum = 2.0 * jnp.sum(z_s[:B] * z_s[B:])

    # Tile selection + padding to MXU/lane-friendly shapes; zero rows/cols are corrected
    # exactly inside the kernel, so arbitrary B / D are supported.
    bm, bn = _pick_blocks(N, block_m, block_n, kind)
    Dp = max(128, _round_up(D, 128))
    Np = _round_up(N, math.lcm(bm, bn))
    z_pad = jnp.pad(z_s, ((0, Np - N), (0, Dp - D))).astype(matmul_dtype)
    nb_i = Np // bm
    nb_j = Np // bn
    acc_w = 128 if bn % 128 == 0 else bn               # lane width of the wide accumulator

    kernel = functools.partial(_ntxent_lse_kernel, inv_t=inv_t,
                               n_valid=N, n_pad=Np - N,
                               block_m=bm, block_n=bn, acc_w=acc_w, exp_dtype=exp_dtype)

    # Plenty of headroom for large (block_m, Dp) row tiles; stay under v7x's 64 MiB physical.
    vmem_limit = (48 if "v7" in kind else 64) * 1024 * 1024

    partials = pl.pallas_call(
        kernel,
        out_shape=jax.ShapeDtypeStruct((nb_i, 8, 128), jnp.float32),
        grid_spec=pltpu.PrefetchScalarGridSpec(
            num_scalar_prefetch=0,
            grid=(nb_i, nb_j),
            in_specs=[pl.BlockSpec((bm, Dp), lambda i, j: (i, 0)),   # row block (reused nb_j x)
                      pl.BlockSpec((bn, Dp), lambda i, j: (j, 0))],  # column block (streamed)
            out_specs=pl.BlockSpec((1, 8, 128), lambda i, j: (i, 0, 0)),
            scratch_shapes=[pltpu.VMEM((bm, acc_w), jnp.float32)],
        ),
        compiler_params=pltpu.CompilerParams(
            dimension_semantics=("parallel", "arbitrary"),
            vmem_limit_bytes=vmem_limit),
    )(z_pad, z_pad)

    lse_sum = jnp.sum(partials[:, 0, 0])
    return (lse_sum - pos_sum) / jnp.float32(N)


def _reference_loss(z_i, z_j, temperature):
    # Pure-JAX reference mirroring the PyTorch forward (no MXU: exact f32 sims).
    B, _ = z_i.shape
    N = 2 * B
    z = jnp.concatenate([z_i, z_j], axis=0).astype(jnp.float32)
    norm = jnp.sqrt(jnp.sum(z * z, axis=-1, keepdims=True))
    sim = jnp.sum(z[:, None, :] * z[None, :, :], axis=-1)
    sim = sim / jnp.maximum(norm * norm.T, 1e-8) / temperature
    idx = jnp.arange(N)
    pos = sim[idx, (idx + B) % N]
    sim_masked = jnp.where(jnp.eye(N, dtype=bool), -jnp.inf, sim)
    lse = jax.scipy.special.logsumexp(sim_masked, axis=1)
    return jnp.sum(lse - pos) / N


if __name__ == "__main__":
    temperature = 0.5
    key = jax.random.PRNGKey(0)
    k1, k2, k3, k4 = jax.random.split(key, 4)

    # --- tiny case (single tile): B=4 -> N=8 rows of the similarity matrix, D=32 ---
    z_i = jax.random.normal(k1, (4, 32), dtype=jnp.float32)
    z_j = jax.random.normal(k2, (4, 32), dtype=jnp.float32)
    ref = _reference_loss(z_i, z_j, temperature)

    # f32 MXU operands: should track the f32 reference closely.
    loss_f32 = simclr_loss(z_i, z_j, temperature, matmul_dtype=jnp.float32)
    jax.block_until_ready(loss_f32)
    assert jnp.allclose(loss_f32, ref, rtol=1e-2, atol=1e-2), (loss_f32, ref)

    # default path: bf16 MXU operands, f32 accumulation / exp / log.
    loss_bf16 = simclr_loss(z_i, z_j, temperature)
    jax.block_until_ready(loss_bf16)
    assert jnp.allclose(loss_bf16, ref, rtol=5e-2, atol=5e-2), (loss_bf16, ref)

    # --- multi-tile case exercising decoupled block_m != block_n, diagonal tiles and
    #     pad columns spanning more than one column tile: B=10 -> N=20, blocks 16x8 ---
    z_i2 = jax.random.normal(k3, (10, 96), dtype=jnp.float32)
    z_j2 = jax.random.normal(k4, (10, 96), dtype=jnp.float32)
    ref2 = _reference_loss(z_i2, z_j2, temperature)
    loss2 = simclr_loss(z_i2, z_j2, temperature, block_m=16, block_n=8,
                        matmul_dtype=jnp.float32)
    jax.block_until_ready(loss2)
    assert jnp.allclose(loss2, ref2, rtol=1e-2, atol=1e-2), (loss2, ref2)

    print("KERNEL_OK")
</pallas_src>

<mosaic_0001>
module attributes {stable_mosaic.version = 11 : i64} {
  func.func @_ntxent_lse_kernel(%arg0: i32, %arg1: i32, %arg2: memref<8x128xf32, #tpu.memory_space<vmem>>, %arg3: memref<8x128xf32, #tpu.memory_space<vmem>>, %arg4: memref<1x8x128xf32, #tpu.memory_space<vmem>>, %arg5: memref<8x8xf32, #tpu.memory_space<vmem>>) attributes {dimension_semantics = [#tpu.dimension_semantics<parallel>, #tpu.dimension_semantics<arbitrary>], iteration_bounds = array<i64: 1, 1>, scalar_prefetch = 0 : i64, scratch_operands = 1 : i64, tpu.core_type = #tpu.core_type<tc>, window_params = [{transform_indices = @transform_0, window_bounds = array<i64: 8, 128>}, {transform_indices = @transform_1, window_bounds = array<i64: 8, 128>}, {transform_indices = @transform_2, window_bounds = array<i64: 1, 8, 128>}]} {
    %c8_i32 = arith.constant 8 : i32
    %0 = arith.muli %arg0, %c8_i32 : i32
    %c8_i32_0 = arith.constant 8 : i32
    %1 = arith.muli %arg1, %c8_i32_0 : i32
    %c0_i32 = arith.constant 0 : i32
    %2 = arith.cmpi eq, %arg1, %c0_i32 : i32
    %3 = arith.extui %2 : i1 to i32
    %c0_i32_1 = arith.constant 0 : i32
    %4 = arith.cmpi ne, %3, %c0_i32_1 : i32
    scf.if %4 {
      %cst_15 = arith.constant 0.000000e+00 : f32
      %24 = vector.broadcast %cst_15 : f32 to vector<8x8xf32>
      %c0_16 = arith.constant 0 : index
      %c0_17 = arith.constant 0 : index
      %25 = vector.load %arg5[%c0_16, %c0_17] : memref<8x8xf32, #tpu.memory_space<vmem>>, vector<8x8xf32>
      tpu.vector_store %arg5[%c0_16, %c0_17], %24 {strides = array<i32>} : memref<8x8xf32, #tpu.memory_space<vmem>>, vector<8x8xf32>,
    } else {
    }
    %c0 = arith.constant 0 : index
    %c0_2 = arith.constant 0 : index
    %5 = vector.load %arg2[%c0, %c0_2] : memref<8x128xf32, #tpu.memory_space<vmem>>, vector<8x128xf32>
    %c0_3 = arith.constant 0 : index
    %c0_4 = arith.constant 0 : index
    %6 = vector.load %arg3[%c0_3, %c0_4] : memref<8x128xf32, #tpu.memory_space<vmem>>, vector<8x128xf32>
    %cst = arith.constant dense<0.000000e+00> : vector<8x8xf32>
    %7 = tpu.matmul %5, %6, %cst {dimension_numbers = #tpu.dot_dimension_numbers<[1], [1], [0], [0], [0, 0, 1, 0], [], []>} : vector<8x128xf32>, vector<8x128xf32>, vector<8x8xf32> -> vector<8x8xf32>
    %cst_5 = arith.constant 2.000000e+00 : f32
    %8 = vector.broadcast %cst_5 : f32 to vector<8x8xf32>
    %9 = arith.subf %7, %8 : vector<8x8xf32>
    %10 = math.exp %9 : vector<8x8xf32>
    %c0_6 = arith.constant 0 : index
    %c0_7 = arith.constant 0 : index
    %11 = vector.load %arg5[%c0_6, %c0_7] : memref<8x8xf32, #tpu.memory_space<vmem>>, vector<8x8xf32>
    %12 = arith.addf %11, %10 : vector<8x8xf32>
    %c0_8 = arith.constant 0 : index
    %c0_9 = arith.constant 0 : index
    %13 = vector.load %arg5[%c0_8, %c0_9] : memref<8x8xf32, #tpu.memory_space<vmem>>, vector<8x8xf32>
    tpu.vector_store %arg5[%c0_8, %c0_9], %12 {strides = array<i32>} : memref<8x8xf32, #tpu.memory_space<vmem>>, vector<8x8xf32>,
    %c8_i32_10 = arith.constant 8 : i32
    %14 = arith.addi %1, %c8_i32_10 : i32
    %15 = arith.cmpi slt, %0, %14 : i32
    %c8_i32_11 = arith.constant 8 : i32
    %16 = arith.addi %0, %c8_i32_11 : i32
    %17 = arith.cmpi slt, %1, %16 : i32
    %18 = arith.andi %15, %17 : i1
    %19 = arith.extui %18 : i1 to i32
    %c0_i32_12 = arith.constant 0 : i32
    %20 = arith.cmpi ne, %19, %c0_i32_12 : i32
    scf.if %20 {
      %24 = tpu.iota {dimensions = array<i32: 0>} : vector<8x8xi32>
      %25 = vector.broadcast %0 : i32 to vector<8x8xi32>
      %26 = arith.addi %25, %24 : vector<8x8xi32>
      %27 = tpu.iota {dimensions = array<i32: 1>} : vector<8x8xi32>
      %28 = vector.broadcast %1 : i32 to vector<8x8xi32>
      %29 = arith.addi %28, %27 : vector<8x8xi32>
      %30 = arith.cmpi eq, %26, %29 : vector<8x8xi32>
      %c8_i32_15 = arith.constant 8 : i32
      %31 = vector.broadcast %c8_i32_15 : i32 to vector<8x8xi32>
      %32 = arith.cmpi slt, %26, %31 : vector<8x8xi32>
      %33 = arith.andi %30, %32 : vector<8x8xi1>
      %cst_16 = arith.constant 0.000000e+00 : f32
      %34 = vector.broadcast %cst_16 : f32 to vector<8x8xf32>
      %35 = arith.select %33, %10, %34 : vector<8x8xi1>, vector<8x8xf32>
      %c0_17 = arith.constant 0 : index
      %c0_18 = arith.constant 0 : index
      %36 = vector.load %arg5[%c0_17, %c0_18] : memref<8x8xf32, #tpu.memory_space<vmem>>, vector<8x8xf32>
      %37 = arith.subf %36, %35 : vector<8x8xf32>
      %c0_19 = arith.constant 0 : index
      %c0_20 = arith.constant 0 : index
      %38 = vector.load %arg5[%c0_19, %c0_20] : memref<8x8xf32, #tpu.memory_space<vmem>>, vector<8x8xf32>
      tpu.vector_store %arg5[%c0_19, %c0_20], %37 {strides = array<i32>} : memref<8x8xf32, #tpu.memory_space<vmem>>, vector<8x8xf32>,
    } else {
    }
    %c0_i32_13 = arith.constant 0 : i32
    %21 = arith.cmpi eq, %arg1, %c0_i32_13 : i32
    %22 = arith.extui %21 : i1 to i32
    %c0_i32_14 = arith.constant 0 : i32
    %23 = arith.cmpi ne, %22, %c0_i32_14 : i32
    scf.if %23 {
      %c0_15 = arith.constant 0 : index
      %c0_16 = arith.constant 0 : index
      %24 = vector.load %arg5[%c0_15, %c0_16] : memref<8x8xf32, #tpu.memory_space<vmem>>, vector<8x8xf32>
      %cst_17 = arith.constant dense<0.000000e+00> : vector<8xf32>
      %25 = vector.multi_reduction <add>, %24, %cst_17 [1] : vector<8x8xf32> to vector<8xf32>
      %26 = vector.shape_cast %25 : vector<8xf32> to vector<8x1xf32>
      %27 = math.log %26 : vector<8x1xf32>
      %cst_18 = arith.constant 2.000000e+00 : f32
      %28 = vector.broadcast %cst_18 : f32 to vector<8x1xf32>
      %29 = arith.addf %27, %28 : vector<8x1xf32>
      %30 = tpu.iota {dimensions = array<i32: 0>} : vector<8x1xi32>
      %31 = vector.broadcast %0 : i32 to vector<8x1xi32>
      %32 = arith.addi %31, %30 : vector<8x1xi32>
      %c8_i32_19 = arith.constant 8 : i32
      %33 = vector.broadcast %c8_i32_19 : i32 to vector<8x1xi32>
      %34 = arith.cmpi slt, %32, %33 : vector<8x1xi32>
      %cst_20 = arith.constant 0.000000e+00 : f32
      %35 = vector.broadcast %cst_20 : f32 to vector<8x1xf32>
      %36 = arith.select %34, %29, %35 : vector<8x1xi1>, vector<8x1xf32>
      %37 = vector.shape_cast %36 : vector<8x1xf32> to vector<1x8x1xf32>
      %cst_21 = arith.constant dense<0.000000e+00> : vector<1xf32>
      %38 = vector.multi_reduction <add>, %37, %cst_21 [1, 2] : vector<1x8x1xf32> to vector<1xf32>
      %39 = vector.shape_cast %38 : vector<1xf32> to vector<1x1x1xf32>
      %40 = vector.extract %39[0, 0, 0] : f32 from vector<1x1x1xf32>
      %41 = vector.broadcast %40 : f32 to vector<1x8x128xf32>
      %c0_22 = arith.constant 0 : index
      %c0_23 = arith.constant 0 : index
      %c0_24 = arith.constant 0 : index
      %42 = vector.load %arg4[%c0_22, %c0_23, %c0_24] : memref<1x8x128xf32, #tpu.memory_space<vmem>>, vector<1x8x128xf32>
      tpu.vector_store %arg4[%c0_22, %c0_23, %c0_24], %41 {strides = array<i32>} : memref<1x8x128xf32, #tpu.memory_space<vmem>>, vector<1x8x128xf32>,
    } else {
    }
    return
  }
  func.func @transform_0(%arg0: i32, %arg1: i32) -> (i32, i32) {
    %c0_i32 = arith.constant 0 : i32
    %c0_i32_0 = arith.constant 0 : i32
    return %arg0, %c0_i32 : i32, i32
  }
  func.func @transform_1(%arg0: i32, %arg1: i32) -> (i32, i32) {
    %c0_i32 = arith.constant 0 : i32
    %c0_i32_0 = arith.constant 0 : i32
    return %arg1, %c0_i32 : i32, i32
  }
  func.func @transform_2(%arg0: i32, %arg1: i32) -> (i32, i32, i32) {
    %c0_i32 = arith.constant 0 : i32
    %c0_i32_0 = arith.constant 0 : i32
    %c0_i32_1 = arith.constant 0 : i32
    return %arg0, %c0_i32, %c0_i32_0 : i32, i32, i32
  }
}

</mosaic_0001>

<bundles_post_ra>
// kernel: tpu_custom_call.1
= control target key start
LH: loop header
LB: loop body
LE: loop exit
PB: predicated region body
PF: predicated region fallthrough
CT: control target
= control target key end

     0   :  { %7 = vsyncpa [#allocation4], 0  ;;  %s342_s0 = inlined_call_operand.hbm [shape: f32[8,128], index: 0, kind: input, shape index: {}]   ;;  %s343_s1 = inlined_call_operand.hbm [shape: f32[8,128], index: 1, kind: input, shape index: {}]   ;;  %s344_s2 = inlined_call_operand.hbm [shape: f32[1,8,128], index: 2, kind: output, shape index: {}]  }
   0x1   :  { %8 = vsyncpa [#allocation7], 0 }
   0x2   :  { %9 = vsyncpa [#allocation5], 0  ;;  %s282_s9 = smov [#allocation3]   ;;  %s283_s11 = smov [#allocation6]  }
   0x3   :  { %s16_s10 = sshll.u32 %s282_s9, 4  ;;  %s26_s12 = sshll.u32 %s283_s11, 4  ;;  %s17_s10 = int_to_ptr.vmem [resolvable:$true] %s16_s10  ;;  %s27_s12 = int_to_ptr.vmem [resolvable:$true] %s26_s12 }
   0x4   :  { %s210_s15 = scalar_lea.hbm %s342_s0, 128 }
   0x5   :  { %p211_p0 = scmp.ne.s32.totalorder %s342_s0, %s210_s15  ;;  %p214_p1 = scmp.lt.u32.totalorder %s210_s15, %s342_s0 }
   0x7   :  { %p216_p2 = pnand %p214_p1, %p211_p0 }
   0x9   :  { %219 = shalt.err (!%p216_p2)
}
   0xa   :  { %s220_s20 = scalar_lea.vmem %s17_s10, 128  ;;  %p225_p4 = scmp.lt.s32.totalorder %s17_s10, %s17_s10 }
   0xb   :  { %p221_p3 = scmp.ne.s32.totalorder %s17_s10, %s220_s20  ;;  %p226_p5 = scmp.lt.s32.totalorder %s220_s20, %s220_s20 }
   0xd   :  { %p227_p6 = por %p226_p5, %p225_p4 }
   0xf   :  { %p228_p7 = pnand %p227_p6, %p221_p3 }
  0x11   :  { %231 = shalt.err (!%p228_p7)
}
  0x12   :  { %19 = dma.hbm_to_vmem [thread:$0]  %s342_s0, 128, %s17_s10, [#allocation4]  }
  0x13   :  { %s232_s25 = scalar_lea.hbm %s343_s1, 128 }
  0x14   :  { %p233_p8 = scmp.ne.s32.totalorder %s343_s1, %s232_s25  ;;  %p236_p9 = scmp.lt.u32.totalorder %s232_s25, %s343_s1 }
  0x16   :  { %p238_p10 = pnand %p236_p9, %p233_p8 }
  0x18   :  { %241 = shalt.err (!%p238_p10)
}
  0x19   :  { %s242_s30 = scalar_lea.vmem %s27_s12, 128  ;;  %p247_p12 = scmp.lt.s32.totalorder %s27_s12, %s27_s12 }
  0x1a   :  { %p243_p11 = scmp.ne.s32.totalorder %s27_s12, %s242_s30  ;;  %p248_p13 = scmp.lt.s32.totalorder %s242_s30, %s242_s30 }
  0x1c   :  { %p249_p0 = por %p248_p13, %p247_p12 }
  0x1e   :  { %p250_p1 = pnand %p249_p0, %p243_p11 }
  0x20   :  { %253 = shalt.err (!%p250_p1)
}
  0x21   :  { %29 = dma.hbm_to_vmem [thread:$0]  %s343_s1, 128, %s27_s12, [#allocation7]  }
  0x22   :  { %276 = dma.done.wait [#allocation4], 128  }
  0x23   :  { %277 = vsyncadd [#allocation4], 4294967168 }
  0x24   :  { %278 = dma.done.wait [#allocation7], 128  }
  0x25   :  { %279 = vsyncadd [#allocation7], 4294967168  ;;  %v284_v0 = vmov 0.0   ;;  %vm285_vm0 = vmmov 0   ;;  %v45_v1 = vld [vmem:[#allocation6] sm:$0xff]  ;;  %v44_v2 = vld [vmem:[#allocation3] sm:$0xff]  ;;  %v131_v8 = vlaneseq }
  0x26   :  { %194 = vmatprep.subr.mxu0 %v284_v0  ;;  %196 = vmatprep.mubr.msk.f32.mxu0 %vm285_vm0, %v284_v0  ;;  %vm42_vm1 = vcmask 64512   ;;  %vm162_vm3 = vcmask 7168   ;;  %s286_s1 = smov [#allocation8]  }
  0x27   :  { %195 = vmatpush3.xpose.msra.mxu0 %v45_v1  ;;  %43 = vst.msk [vmem:[#allocation2] sm:$0xff] %vm42_vm1, %v284_v0  ;;  %v132_v11 = vshrl.u32 %v131_v8, 7  ;;  %v136_v12 = vand.u32 127, %v131_v8  ;;  %s181_s4 = sshll.u32 %s286_s1, 4  ;;  %s182_s4 = int_to_ptr.vmem [resolvable:$true] %s181_s4 }
  0x28   :  { %s254_s6 = scalar_lea.vmem %s182_s4, 128  ;;  %p259_p3 = scmp.lt.s32.totalorder %s182_s4, %s182_s4 }
  0x29   :  { %vm139_vm2 = vcmp.eq.s32.totalorder %v132_v11, %v136_v12  ;;  %p255_p2 = scmp.ne.s32.totalorder %s182_s4, %s254_s6  ;;  %p260_p4 = scmp.lt.s32.totalorder %s254_s6, %s254_s6 }
  0x2a   :  { %197 = vmatmul.mubr.f32.vlgmr.msra.gmra.mrb[0].mxu0 %v44_v2 }
  0x2b   :  { %p261_p5 = por %p260_p4, %p259_p3 }
  0x2d   :  { %p262_p6 = pnand %p261_p5, %p255_p2 }
  0x2e   :  { %v119_v7 = vld [vmem:[#allocation2] sm:$0xff] }
  0xfd   :  { %v112_v3 = vpop.f32.mrb[0].mxu0 }
  0xfe   :  { %v191_v4 = vadd.f32 -2.0, %v112_v3  ;;  %v198_v5 = vpop.f32.mrb[1].mxu0 }
 0x100   :  { %v117_v6 = vmul.f32 1.442695, %v191_v4 }
 0x102   :  { %206 = vpow2.f32 %v117_v6 }
 0x10c   :  { %v207_v9 = vpop.eup %206 }
 0x10d   :  { %v120_v10 = vadd.f32 %v207_v9, %v119_v7  ;;  %v142_v13 = vsel %vm139_vm2, %v207_v9, 0.0 }
 0x10f   :  { %122 = vst.msk [vmem:[#allocation2] sm:$0xff] %vm42_vm1, %v120_v10 }
 0x116   :  { %v143_v14 = vld [vmem:[#allocation2] sm:$0xff] }
 0x117   :  { %v144_v15 = vsub.f32 %v143_v14, %v142_v13 }
 0x119   :  { %145 = vst.msk [vmem:[#allocation2] sm:$0xff] %vm42_vm1, %v144_v15 }
 0x120   :  { %v149_v16 = vld [vmem:[#allocation2] sm:$0xff] }
 0x121   :  { %v150_v17 = vsel %vm42_vm1, %v149_v16, 0.0 }
 0x122   :  { %151 = vadd.xlane.f32.xlu0 %v150_v17 }
 0x1af   :  { %v152_v18 = vpop.xlane.xlu0 %151 }
 0x1b0   :  { %208 = vlog2.f32 %v152_v18 }
 0x1ba   :  { %v209_v19 = vpop.eup %208 }
 0x1bb   :  { %v154_v20 = vmul.f32 0.6931472, %v209_v19 }
 0x1bd   :  { %v155_v21 = vadd.f32 2.0, %v154_v20 }
 0x1bf   :  { %v163_v22 = vsel %vm162_vm3, %v155_v21, 0.0 }
 0x1c0   :  { %164 = vadd.xlane.f32.xlu0 %v163_v22 }
 0x24d   :  { %v165_v23 = vpop.xlane.xlu0 %164 }
 0x24e   :  { %v166_v24 = vrot.slane %v165_v23, 4 }
 0x250   :  { %v167_v25 = vadd.f32 %v166_v24, %v165_v23 }
 0x252   :  { %v168_v26 = vrot.slane %v167_v25, 2 }
 0x254   :  { %v169_v27 = vadd.f32 %v168_v26, %v167_v25 }
 0x256   :  { %v170_v28 = vrot.slane %v169_v27, 1 }
 0x258   :  { %v171_v29 = vadd.f32 %v170_v28, %v169_v27 }
 0x25a   :  { %199 = vpush %v171_v29 }
 0x28b   :  { %s200_s5 = spop %199 }
 0x28c   :  { %v173_v30 = vstv %s200_s5 }
 0x28d   :  { %174 = vst [vmem:[#allocation8] sm:$0xff] %v173_v30 }
 0x28e   :  { %265 = shalt.err (!%p262_p6)
}
 0x28f   :  { %s266_s9 = scalar_lea.hbm %s344_s2, 128 }
 0x290   :  { %p267_p7 = scmp.ne.s32.totalorder %s344_s2, %s266_s9  ;;  %p270_p8 = scmp.lt.u32.totalorder %s266_s9, %s344_s2 }
 0x292   :  { %p272_p9 = pnand %p270_p8, %p267_p7 }
 0x294   :  { %275 = shalt.err (!%p272_p9)
}
 0x295   :  { %184 = dma.vmem_to_hbm [thread:$0]  %s182_s4, 128, %s344_s2, [#allocation5]  }
 0x296   :  { %280 = dma.done.wait [#allocation5], 128  }
 0x297   :  { %281 = vsyncadd [#allocation5], 4294967168 }
 0x298   :  { %188 = vsyncpa [#allocation4], 1 }
 0x299   :  { %189 = vsyncpa [#allocation7], 1 }
 0x29a   :  { %190 = vsyncpa [#allocation5], 1 }

</bundles_post_ra>
